<compile_context>
chip_gen: v5e
topology: v5e:2x2
jax: 0.10.0
libtpu: 0.0.40
codegen_flags: <defaults>
</compile_context>

<pallas_src>
import functools

import jax
import jax.numpy as jnp
import numpy as np
from jax import lax
from jax.experimental import pallas as pl
from jax.experimental.pallas import tpu as pltpu


_F32_TEMPS = 7               # worst-case live f32 intermediates per input element
_HEADROOM = 2 << 20          # output double-buffers, semaphores, compiler scratch
_MAX_INPUT_TILE = 16 << 20   # diminishing returns past ~16 MiB per input buffer
_MIN_SPLIT_BYTES = 256 << 10 # only force >=2 grid steps when one tile is this big


def _vmem_capacity_bytes() -> int:
    """Physical VMEM per TensorCore (128 MiB v5e/v6e, 64 MiB v7x)."""
    try:
        cap = getattr(pltpu.get_tpu_info(), "vmem_capacity_bytes", None)
        if cap:
            return int(cap)
    except Exception:
        pass
    return 64 << 20          # conservative, v7x-sized fallback


def _tile_sum(d2):
    """Sum a (ct, rows, cols) f32 block to a scalar.

    The channel fold and 8-row folds are plain VPU adds; for wide rows the
    128-lane axis is collapsed on the (otherwise idle) MXU with a ones-vector
    matmul, leaving only a short sublane reduce for the XLU.
    """
    ct, r, c = d2.shape
    m = d2.reshape(r, c) if ct == 1 else jnp.sum(d2, axis=0)   # VPU channel fold
    if c >= 128:
        col = jnp.dot(m, jnp.ones((c, 1), jnp.float32),
                      preferred_element_type=jnp.float32)       # (r, 1) on the MXU
        return jnp.sum(col)
    if r % 8 == 0 and r > 8:
        folded = m.reshape(r // 8, 8, c)
        return jnp.sum(jnp.sum(folded, axis=0))                 # VPU folds, tiny XLU finish
    return jnp.sum(m)


def _tv_kernel(x_ref, out_ref, *, total_h: int, ragged: bool):
    """One (batch, channel-tile, row-tile) step: partial h/w squared-diff sums."""
    ct, th, w = x_ref.shape
    x = x_ref[...].astype(jnp.float32)

    # Forward differences with the exact PyTorch slice semantics: no wrap rows,
    # no neighbour masks, no roll-direction assumptions.
    if th > 1:
        dh2 = x[:, 1:, :] - x[:, : th - 1, :]
        dh2 = dh2 * dh2
    else:
        dh2 = None
    if w > 1:
        dw2 = x[:, :, 1:] - x[:, :, : w - 1]
        dw2 = dw2 * dw2
    else:
        dw2 = None

    if ragged:
        # Last row-tile sticks out past H: drop the unspecified padding rows.
        base = pl.program_id(2) * th
        if dh2 is not None:
            rows = base + lax.broadcasted_iota(jnp.int32, (th - 1, 1), 0)
            dh2 = jnp.where(rows < total_h - 1, dh2, 0.0)
        if dw2 is not None:
            rows = base + lax.broadcasted_iota(jnp.int32, (th, 1), 0)
            dw2 = jnp.where(rows < total_h, dw2, 0.0)

    h_sum = _tile_sum(dh2) if dh2 is not None else jnp.float32(0.0)
    w_sum = _tile_sum(dw2) if dw2 is not None else jnp.float32(0.0)

    # Single (1, 1, 2) writeback per grid step: h partial in lane 0, w in lane 1.
    lane = lax.broadcasted_iota(jnp.int32, (1, 1, 2), 2)
    out_ref[...] = jnp.where(lane == 0, h_sum, w_sum)


def tv_loss(x, tv_loss_weight: float = 1.0, *, max_tile_bytes=None):
    """Total variation loss, matching TVLoss.forward semantics exactly.

    max_tile_bytes: optional cap on the per-step input tile (bytes); mainly
    used to exercise the channel/row tiling paths on small test inputs.
    """
    B, C, H, W = x.shape

    # The loss is symmetric in the two spatial axes: when the lane axis (W) is
    # sparse, swap so the larger spatial dim is lane-dense.
    if W < H and W < 128:
        x = jnp.swapaxes(x, 2, 3)
        H, W = W, H

    itemsize = jnp.dtype(x.dtype).itemsize
    nelem = B * C * H * W

    # ---- generation-aware VMEM / tile budget --------------------------------
    gen_limit = _vmem_capacity_bytes() * 3 // 4    # ~96 MiB v5e/v6e, ~48 MiB v7x
    per_elem = 2 * itemsize + _F32_TEMPS * 4       # double-buffered input + f32 temps
    budget_elems = max((gen_limit - _HEADROOM) // per_elem, 8 * 128)
    budget_elems = min(budget_elems, _MAX_INPUT_TILE // itemsize)
    if max_tile_bytes is not None:
        budget_elems = max(min(budget_elems, max_tile_bytes // itemsize), 8)

    # ---- channel / row tiling ------------------------------------------------
    per_chan = H * W
    if per_chan <= budget_elems:
        ct = 1
        for cand in range(1, C + 1):               # largest divisor of C that fits
            if C % cand == 0 and cand * per_chan <= budget_elems:
                ct = cand
        th = H
    else:
        # One channel per step, stream rows in multiples of 8.  Prefer a row
        # count that divides H (keeps every tile mask-free); otherwise the
        # ragged last tile is handled by the in-kernel global-row mask.
        # TODO(synk): a single 8-row stripe can still exceed the budget for
        # extremely wide W; accept the overshoot there.
        ct = 1
        max_rows = min(H, max(8, (budget_elems // W) // 8 * 8))
        th = max_rows
        for cand in range(max_rows, max(7, (max_rows // 2) // 8 * 8 - 1), -8):
            if H % cand == 0:
                th = cand
                break
    num_ct = C // ct
    num_h = -(-H // th)

    # Guarantee >=2 grid steps for non-trivial inputs so megacore (v7x) and the
    # DMA/compute pipeline have something to overlap.
    if B * num_ct * num_h < 2 and H >= 16 and ct * per_chan * itemsize > _MIN_SPLIT_BYTES:
        th = min(H, -(-((H + 1) // 2) // 8) * 8)
        num_h = -(-H // th)

    ragged = (H % th) != 0
    steps = B * num_ct * num_h
    tile_elems = ct * th * W
    needed = 2 * tile_elems * itemsize + _F32_TEMPS * tile_elems * 4 + _HEADROOM
    vmem_limit = int(max(min(needed, gen_limit), 16 << 20))

    cost = pl.CostEstimate(
        flops=7 * nelem,
        transcendentals=0,
        bytes_accessed=nelem * itemsize + steps * 2 * 4,
    )

    kernel = functools.partial(_tv_kernel, total_h=H, ragged=ragged)
    parts = pl.pallas_call(
        kernel,
        out_shape=jax.ShapeDtypeStruct((steps, 1, 2), jnp.float32),
        grid_spec=pltpu.PrefetchScalarGridSpec(
            num_scalar_prefetch=0,
            # row-tile innermost: consecutive DMAs stream contiguous NCHW memory
            grid=(B, num_ct, num_h),
            in_specs=[
                pl.BlockSpec((None, ct, th, W), lambda b, c, h: (b, c, h, 0)),
            ],
            out_specs=pl.BlockSpec(
                (1, 1, 2), lambda b, c, h: ((b * num_ct + c) * num_h + h, 0, 0)),
        ),
        compiler_params=pltpu.CompilerParams(
            dimension_semantics=("parallel", "parallel", "parallel"),
            vmem_limit_bytes=vmem_limit,
        ),
        cost_estimate=cost,
    )(x)

    h_sum = jnp.sum(parts[:, 0, 0])
    w_sum = jnp.sum(parts[:, 0, 1])

    # Re-add the inter-row-tile boundary diffs that individual tiles cannot see.
    if num_h > 1:
        bidx = np.arange(1, num_h) * th            # first row of tiles 1..num_h-1
        d = (x[:, :, bidx, :].astype(jnp.float32)
             - x[:, :, bidx - 1, :].astype(jnp.float32))
        h_sum = h_sum + jnp.sum(d * d)

    # H == 1 or W == 1 yields 0/0 = nan, exactly like the PyTorch module.
    count_h = C * (H - 1) * W
    count_w = C * H * (W - 1)
    return tv_loss_weight * 2.0 * (h_sum / count_h + w_sum / count_w) / B


if __name__ == "__main__":
    def _reference(x):
        dh = x[:, :, 1:, :] - x[:, :, :-1, :]
        dw = x[:, :, :, 1:] - x[:, :, :, :-1]
        count_h = x.shape[1] * (x.shape[2] - 1) * x.shape[3]
        count_w = x.shape[1] * x.shape[2] * (x.shape[3] - 1)
        return 2.0 * (jnp.sum(dh ** 2) / count_h
                      + jnp.sum(dw ** 2) / count_w) / x.shape[0]

    key = jax.random.PRNGKey(0)
    k1, k2, k3 = jax.random.split(key, 3)

    # 1) primary shape from the module spec: whole-channel tiles, 2 grid steps.
    x1 = jax.random.normal(key, (2, 4, 16, 16), dtype=jnp.float32)
    out1 = jax.block_until_ready(tv_loss(x1, tv_loss_weight=1.0))
    assert jnp.allclose(out1, _reference(x1), rtol=5e-4, atol=1e-5), (out1, _reference(x1))

    # 2) forced channel + ragged row tiling (C=3, th=24 over H=82) and the
    #    MXU lane-reduce path (W=160 >= 128).
    x2 = jax.random.normal(k1, (1, 3, 82, 160), dtype=jnp.float32)
    out2 = jax.block_until_ready(tv_loss(x2, max_tile_bytes=24 * 160 * 4))
    assert jnp.allclose(out2, _reference(x2), rtol=5e-4, atol=1e-5), (out2, _reference(x2))

    # 3) lane-sparse input -> automatic H/W swap.
    x3 = jax.random.normal(k2, (2, 2, 64, 16), dtype=jnp.float32)
    out3 = jax.block_until_ready(tv_loss(x3))
    assert jnp.allclose(out3, _reference(x3), rtol=5e-4, atol=1e-5), (out3, _reference(x3))

    # 4) single-slab input -> forced >=2 grid steps (megacore / pipelining)
    #    with an even (mask-free) row split plus wrapper boundary correction.
    x4 = jax.random.normal(k3, (1, 1, 256, 512), dtype=jnp.float32)
    out4 = jax.block_until_ready(tv_loss(x4))
    assert jnp.allclose(out4, _reference(x4), rtol=5e-4, atol=1e-5), (out4, _reference(x4))

    print("KERNEL_OK")
</pallas_src>

<mosaic_0001>
module attributes {stable_mosaic.version = 11 : i64} {
  func.func @_tv_kernel(%arg0: i32, %arg1: i32, %arg2: i32, %arg3: memref<1x4x16x16xf32, #tpu.memory_space<vmem>>, %arg4: memref<1x1x2xf32, #tpu.memory_space<vmem>>) attributes {dimension_semantics = [#tpu.dimension_semantics<parallel>, #tpu.dimension_semantics<parallel>, #tpu.dimension_semantics<parallel>], iteration_bounds = array<i64: 2, 1, 1>, scalar_prefetch = 0 : i64, scratch_operands = 0 : i64, tpu.core_type = #tpu.core_type<tc>, window_params = [{transform_indices = @transform_0, window_bounds = array<i64: 1, 4, 16, 16>}, {transform_indices = @transform_1, window_bounds = array<i64: 1, 1, 2>}]} {
    %c0 = arith.constant 0 : index
    %c0_0 = arith.constant 0 : index
    %c0_1 = arith.constant 0 : index
    %c0_2 = arith.constant 0 : index
    %0 = vector.load %arg3[%c0, %c0_0, %c0_1, %c0_2] : memref<1x4x16x16xf32, #tpu.memory_space<vmem>>, vector<1x4x16x16xf32>
    %1 = vector.shape_cast %0 : vector<1x4x16x16xf32> to vector<4x16x16xf32>
    %2 = vector.extract_strided_slice %1 {offsets = [0, 1, 0], sizes = [4, 15, 16], strides = [1, 1, 1]} : vector<4x16x16xf32> to vector<4x15x16xf32>
    %3 = vector.extract_strided_slice %1 {offsets = [0, 0, 0], sizes = [4, 15, 16], strides = [1, 1, 1]} : vector<4x16x16xf32> to vector<4x15x16xf32>
    %4 = arith.subf %2, %3 : vector<4x15x16xf32>
    %5 = arith.mulf %4, %4 : vector<4x15x16xf32>
    %6 = vector.extract_strided_slice %1 {offsets = [0, 0, 1], sizes = [4, 16, 15], strides = [1, 1, 1]} : vector<4x16x16xf32> to vector<4x16x15xf32>
    %7 = vector.extract_strided_slice %1 {offsets = [0, 0, 0], sizes = [4, 16, 15], strides = [1, 1, 1]} : vector<4x16x16xf32> to vector<4x16x15xf32>
    %8 = arith.subf %6, %7 : vector<4x16x15xf32>
    %9 = arith.mulf %8, %8 : vector<4x16x15xf32>
    %cst = arith.constant dense<0.000000e+00> : vector<15x16xf32>
    %10 = vector.multi_reduction <add>, %5, %cst [0] : vector<4x15x16xf32> to vector<15x16xf32>
    %11 = vector.shape_cast %10 : vector<15x16xf32> to vector<1x15x16xf32>
    %cst_3 = arith.constant dense<0.000000e+00> : vector<1xf32>
    %12 = vector.multi_reduction <add>, %11, %cst_3 [1, 2] : vector<1x15x16xf32> to vector<1xf32>
    %13 = vector.shape_cast %12 : vector<1xf32> to vector<1x1x1xf32>
    %14 = vector.extract %13[0, 0, 0] : f32 from vector<1x1x1xf32>
    %cst_4 = arith.constant dense<0.000000e+00> : vector<16x15xf32>
    %15 = vector.multi_reduction <add>, %9, %cst_4 [0] : vector<4x16x15xf32> to vector<16x15xf32>
    %16 = vector.shape_cast %15 : vector<16x15xf32> to vector<2x8x15xf32>
    %cst_5 = arith.constant dense<0.000000e+00> : vector<8x15xf32>
    %17 = vector.multi_reduction <add>, %16, %cst_5 [0] : vector<2x8x15xf32> to vector<8x15xf32>
    %18 = vector.shape_cast %17 : vector<8x15xf32> to vector<1x8x15xf32>
    %cst_6 = arith.constant dense<0.000000e+00> : vector<1xf32>
    %19 = vector.multi_reduction <add>, %18, %cst_6 [1, 2] : vector<1x8x15xf32> to vector<1xf32>
    %20 = vector.shape_cast %19 : vector<1xf32> to vector<1x1x1xf32>
    %21 = vector.extract %20[0, 0, 0] : f32 from vector<1x1x1xf32>
    %22 = tpu.iota {dimensions = array<i32: 2>} : vector<1x1x2xi32>
    %c0_i32 = arith.constant 0 : i32
    %23 = vector.broadcast %c0_i32 : i32 to vector<1x1x2xi32>
    %24 = arith.cmpi eq, %22, %23 : vector<1x1x2xi32>
    %25 = vector.broadcast %14 : f32 to vector<1x1x2xf32>
    %26 = vector.broadcast %21 : f32 to vector<1x1x2xf32>
    %27 = arith.select %24, %25, %26 : vector<1x1x2xi1>, vector<1x1x2xf32>
    %c0_7 = arith.constant 0 : index
    %c0_8 = arith.constant 0 : index
    %c0_9 = arith.constant 0 : index
    %28 = vector.load %arg4[%c0_7, %c0_8, %c0_9] : memref<1x1x2xf32, #tpu.memory_space<vmem>>, vector<1x1x2xf32>
    tpu.vector_store %arg4[%c0_7, %c0_8, %c0_9], %27 {strides = array<i32>} : memref<1x1x2xf32, #tpu.memory_space<vmem>>, vector<1x1x2xf32>,
    return
  }
  func.func @transform_0(%arg0: i32, %arg1: i32, %arg2: i32) -> (i32, i32, i32, i32) {
    %c0_i32 = arith.constant 0 : i32
    %c0_i32_0 = arith.constant 0 : i32
    return %arg0, %arg1, %arg2, %c0_i32 : i32, i32, i32, i32
  }
  func.func @transform_1(%arg0: i32, %arg1: i32, %arg2: i32) -> (i32, i32, i32) {
    %c1_i32 = arith.constant 1 : i32
    %0 = arith.muli %arg0, %c1_i32 : i32
    %1 = arith.addi %0, %arg1 : i32
    %c1_i32_0 = arith.constant 1 : i32
    %2 = arith.muli %1, %c1_i32_0 : i32
    %3 = arith.addi %2, %arg2 : i32
    %c0_i32 = arith.constant 0 : i32
    %c0_i32_1 = arith.constant 0 : i32
    %c0_i32_2 = arith.constant 0 : i32
    return %3, %c0_i32, %c0_i32_1 : i32, i32, i32
  }
}

</mosaic_0001>

<bundles_post_ra>
// kernel: tpu_custom_call.1
= control target key start
LH: loop header
LB: loop body
LE: loop exit
PB: predicated region body
PF: predicated region fallthrough
CT: control target
= control target key end

     0   :  { %6 = vsyncpa [#allocation3], 0  ;;  %s844_s0 = inlined_call_operand.hbm [shape: f32[2,4,16,16], index: 0, kind: input, shape index: {}]   ;;  %s845_s1 = inlined_call_operand.hbm [shape: f32[2,1,2], index: 1, kind: output, shape index: {}]  }
   0x1   :  { %8 = vsyncpa [#allocation3 + $0x1], 0 }
   0x2   :  { %9 = vsyncpa [#allocation4], 0 }
   0x3   :  { %11 = vsyncpa [#allocation4 + $0x1], 0  ;;  %s652_s6 = smov 0   ;;  %s654_s7 = smov 0  }
   0x4   :  { %s656_s8 = smov 0   ;;  %s658_s9 = smov 0  }
   0x5   :  { %s660_s10 = smov 0   ;;  %s662_s11 = smov 0  }
   0x6 LB: > { %s442_s12 = sadd.s32 4294967295, %s636_s11   ;;  %s443_s13 = sadd.s32 4294967294, %s636_s11   ;;  %s636_s11 = sphi %s662_s11, %s17_s11   ;;  %s632_s10 = sphi %s660_s10, %s854_s10   ;;  %s628_s9 = sphi %s658_s9, %s853_s9   ;;  %s624_s8 = sphi %s656_s8, %s852_s8   ;;  %s620_s7 = sphi %s654_s7, %s851_s7   ;;  %s616_s6 = sphi %s652_s6, %s850_s6  }
   0x7   : > { %s36_s14 = sadd.s32 1, %s632_s10  ;;  %s47_s15 = sadd.s32 1, %s624_s8 }
   0x8   : > { %p38_p0 = scmp.ge.s32.totalorder %s36_s14, 2  ;;  %p54_p1 = scmp.ne.s32.totalorder %s624_s8, %s620_s7 }
   0x9   : > { %p55_p2 = scmp.eq.s32.totalorder %s636_s11, 0  ;;  %p60_p3 = scmp.ne.s32.totalorder %s620_s7, %s616_s6 }
   0xa   : > { %s856_s14 = smov (%p38_p0, %s36_s14), 0  ;;  %p61_p5 = scmp.eq.s32.totalorder %s442_s12, 0 }
   0xb   : > { %p693_p4 = por %p55_p2, %p54_p1  ;;  %s40_s17 = ssub.s32 %s632_s10, %s856_s14 }
   0xc   : > { %p88_p6 = scmp.eq.s32.totalorder %s442_s12, 1  ;;  %p45_p7 = scmp.eq.s32.totalorder %s40_s17, 0 }
   0xd   : > { %p699_p8 = por %p61_p5, %p60_p3  ;;  %p94_p10 = scmp.eq.s32.totalorder %s443_s13, 1 }
   0xe   : > { %p703_p9 = por %p88_p6, %p54_p1  ;;  %p445_p12 = scmp.ge.s32.totalorder %s636_s11, 2 }
   0xf   : > { %s708_s20 = scalar_select %p45_p7, %s624_s8, %s47_s15  }
  0x10   : > { %p710_p11 = por %p94_p10, %p60_p3  ;;  %p470_p13 = scmp.lt.s32.totalorder %s636_s11, 2 }
  0x11   : > { %s114_s22 = sand.u32 1, %s624_s8   ;;  %s453_s24 = sshll.u32 %s632_s10, 6 }
  0x12   : > { %s446_s23 = sshll.u32 %s114_s22, 6  ;;  %s128_s27 = scalar_lea.hbm %s844_s0, %s453_s24 }
  0x13   : > { %s118_s28 = scalar_lea.vmem [#allocation2], %s446_s23  ;;  %s129_s30 = sshll.u32 %s128_s27, 4  ;;  %s130_s30 = int_to_ptr.hbm [resolvable:$true] %s129_s30 }
  0x14   : > { %s131_s29 = sshll.u32 %s118_s28, 4  ;;  %p463_p0 = pnand %p470_p13, %p693_p4  ;;  %s132_s29 = int_to_ptr.vmem [resolvable:$true] %s131_s29 }
  0x15   : > { %p449_p1 = scmp.ge.s32.totalorder %s636_s11, 1  ;;  %s115_s2 = scalar_lea.sflag [#allocation3], %s114_s22 }
  0x16   : > { %s638_s3 = smov 128   ;;  %s639_s4 = smov 8  }
  0x17   : > { %465 = dma.hbm_to_vmem [thread:$0]  (!%p463_p0), %s130_s30, 1024, %s132_s29, %s115_s2, %s638_s3, %s638_s3, %s639_s4  }
  0x18   : > { %p139_p2 = scmp.lt.s32.totalorder %s636_s11, 3 }
  0x1a   : > { %p140_p3 = pnand %p449_p1, %p139_p2 }
  0x1b   : > { %s726_s5 = sand.u32 (!%p140_p3), 1, %s620_s7  }
  0x1c   : > { %143 = sbr.rel (%p140_p3) target bundleno = 451 (0x1c3), region = 24  ;;  %s450_s12 = sshll.u32 (!%p140_p3), %s726_s5, 6 }
  0x1d   : > { %s146_s13 = scalar_lea.sflag (!%p140_p3), [#allocation3], %s726_s5  ;;  %s149_s15 = scalar_lea.vmem (!%p140_p3), [#allocation2], %s450_s12 }
  0x21   : > { %607 = dma.done.wait (%p699_p8), %s146_s13, 1024  }
  0x22   : > { %609 = vsyncadd (%p699_p8), %s146_s13, 4294966272  ;;  %v734_v0 = vld [vmem:[%s149_s15 + $0x10] sm:$0xff]  ;;  %v736_v1 = vld [vmem:[%s149_s15] sm:$0xff]  ;;  %s640_s16 = smov 1   ;;  %vm188_vm0 = vcmask 1040384   ;;  %vm265_vm1 = vcmask 130049   ;;  %s354_s23 = scalar_lea.hbm %s845_s1, %s628_s9 }
  0x23   : > { %229 = vrot.lane.b32.xlu1 %v734_v0, %s640_s16  ;;  %225 = vrot.lane.b32.xlu0 %v736_v1, %s640_s16  ;;  %v740_v2 = vld [vmem:[%s149_s15 + $0x20] sm:$0xff]  ;;  %v743_v3 = vld [vmem:[%s149_s15 + $0x18] sm:$0xff]  ;;  %v192_v8 = vrot.slane %v734_v0, 7  ;;  %v189_v9 = vrot.slane %v736_v1, 7  ;;  %vm273_vm2 = vcmask 130048   ;;  %vm283_vm3 = vcmask 1046528  }
  0x24   : > { %233 = vrot.lane.b32.xlu2 %v740_v2, %s640_s16  ;;  %v745_v4 = vld [vmem:[%s149_s15 + $0x8] sm:$0xff]  ;;  %v752_v6 = vld [vmem:[%s149_s15 + $0x38] sm:$0xff]  ;;  %v754_v7 = vld [vmem:[%s149_s15 + $0x30] sm:$0xff]  ;;  %v193_v10 = vrot.slane %v743_v3, 7  ;;  %v195_v14 = vrot.slane %v740_v2, 7  ;;  %vm290_vm4 = vcmask 129024  }
  0x25   : > { %v747_v5 = vld [vmem:[%s149_s15 + $0x28] sm:$0xff]  ;;  %v211_v11 = vsub.f32 %v734_v0, %v192_v8  ;;  %v209_v12 = vsub.f32 %v736_v1, %v189_v9  ;;  %v190_v13 = vrot.slane %v745_v4, 7  ;;  %v198_v17 = vrot.slane %v754_v7, 7  ;;  %s641_s17 = smov 127   ;;  %s167_s24 = scalar_lea.vmem [#allocation5], %s726_s5 }
  0x26   : > { %v196_v15 = vrot.slane %v747_v5, 7  ;;  %v194_v16 = vsel %vm188_vm0, %v192_v8, %v193_v10  ;;  %v213_v21 = vsub.f32 %v740_v2, %v195_v14  ;;  %v199_v31 = vrot.slane %v752_v6, 7  ;;  %s356_s25 = sshll.u32 %s167_s24, 4  ;;  %s358_s27 = sshll.u32 %s354_s23, 4  ;;  %s357_s25 = int_to_ptr.vmem [resolvable:$true] %s356_s25  ;;  %s359_s27 = int_to_ptr.hbm [resolvable:$true] %s358_s27 }
  0x27   : > { %v219_v18 = vmul.f32 %v211_v11, %v211_v11  ;;  %v217_v19 = vmul.f32 %v209_v12, %v209_v12  ;;  %v191_v20 = vsel %vm188_vm0, %v189_v9, %v190_v13  ;;  %v212_v23 = vsub.f32 %v743_v3, %v194_v16  ;;  %s344_s29 = scalar_lea.sflag [#allocation4], %s726_s5  ;;  %s568_s30 = sshra.s32 %s359_s27, 4  ;;  %s569_s30 = int_to_ptr.hbm [resolvable:$true] %s568_s30 }
  0x28   : > { %v197_v22 = vsel %vm188_vm0, %v195_v14, %v196_v15  ;;  %v210_v24 = vsub.f32 %v745_v4, %v191_v20  ;;  %v215_v25 = vsub.f32 %v754_v7, %v198_v17  ;;  %v221_v28 = vmul.f32 %v213_v21, %v213_v21  ;;  %s570_s2 = scalar_lea.hbm %s569_s30, 1  ;;  %s574_s4 = scalar_lea.hbm %s845_s1, 2 }
  0x29   : > { %v267_v26 = vsel %vm265_vm1, %v219_v18, 0.0  ;;  %v266_v27 = vsel %vm265_vm1, %v217_v19, 0.0  ;;  %v214_v29 = vsub.f32 %v747_v5, %v197_v22  ;;  %v220_v33 = vmul.f32 %v212_v23, %v212_v23  ;;  %p571_p4 = scmp.ne.s32.totalorder %s569_s30, %s570_s2  ;;  %p575_p7 = scmp.lt.s32.totalorder %s569_s30, %s845_s1 }
  0x2a   : > { %v268_v30 = vadd.f32 %v267_v26, %v266_v27  ;;  %v223_v32 = vmul.f32 %v215_v25, %v215_v25  ;;  %v218_v34 = vmul.f32 %v210_v24, %v210_v24  ;;  %v269_v35 = vsel %vm265_vm1, %v221_v28, 0.0  ;;  %p576_p8 = scmp.lt.s32.totalorder %s574_s4, %s570_s2 }
  0x2b   : > { %231 = vrot.lane.b32.xlu1 %v743_v3, %s640_s16  ;;  %227 = vrot.lane.b32.xlu0 %v745_v4, %s640_s16  ;;  %v222_v36 = vmul.f32 %v214_v29, %v214_v29  ;;  %v200_v38 = vsel %vm188_vm0, %v198_v17, %v199_v31  ;;  %v275_v43 = vsel %vm273_vm2, %v220_v33, 0.0  ;;  %vm302_vm5 = vcmask 130056   ;;  %p572_p5 = pnand %p571_p4, %p703_p9 }
  0x2c   : > { %235 = vrot.lane.b32.xlu2 %v747_v5, %s640_s16  ;;  %v270_v39 = vadd.f32 %v269_v35, %v268_v30  ;;  %v271_v40 = vsel %vm265_vm1, %v223_v32, 0.0  ;;  %v216_v41 = vsub.f32 %v752_v6, %v200_v38  ;;  %v274_v42 = vsel %vm273_vm2, %v218_v34, 0.0  ;;  %p577_p10 = por %p576_p8, %p575_p7 }
  0x2d   : > { %v277_v44 = vsel %vm273_vm2, %v222_v36, 0.0  ;;  %v276_v46 = vadd.f32 %v275_v43, %v274_v42  ;;  %vm324_vm6 = vcmask 121856   ;;  %vm341_vm8 = vcmask 8192   ;;  %p573_p6 = pneg %p572_p5 }
  0x2e   : > { %v272_v45 = vadd.f32 %v271_v40, %v270_v39  ;;  %v224_v47 = vmul.f32 %v216_v41, %v216_v41 }
  0x2f   : > { %v278_v48 = vadd.f32 %v277_v44, %v276_v46  ;;  %p578_p13 = pnand %p577_p10, %p573_p6 }
  0x30   : > { %v279_v51 = vsel %vm273_vm2, %v224_v47, 0.0  ;;  %v284_v53 = vrot.slane %v272_v45, 1 }
  0x31   : > { %v280_v52 = vadd.f32 %v279_v51, %v278_v48 }
  0x33   : > { %239 = vrot.lane.b32.xlu1 %v752_v6, %s640_s16  ;;  %237 = vrot.lane.b32.xlu0 %v754_v7, %s640_s16  ;;  %v285_v54 = vrot.slane %v280_v52, 1 }
  0x35   : > { %v286_v58 = vsel %vm283_vm3, %v284_v53, %v285_v54  ;;  %v291_v59 = vsel %vm290_vm4, %v285_v54, 0.0 }
  0x36   : > { %v289_v60 = vsel %vm273_vm2, %v286_v58, 0.0 }
  0x37   : > { %v292_v61 = vadd.f32 %v291_v59, %v289_v60 }
  0x5d   : > { %293 = vadd.xlane.f32.xlu0 %v292_v61 }
  0x7e   : > { %v234_v37 = vpop.permute.xlu2 %233 }
  0x7f   : > { %v253_v62 = vsub.f32 %v740_v2, %v234_v37 }
  0x81   : > { %v261_v14 = vmul.f32 %v253_v62, %v253_v62 }
  0x86   : > { %v236_v57 = vpop.permute.xlu2 %235 }
  0x87   : > { %v254_v9 = vsub.f32 %v747_v5, %v236_v57 }
  0x89   : > { %v262_v15 = vmul.f32 %v254_v9, %v254_v9 }
  0x8b   : > { %v313_v21 = vsel %vm302_vm5, %v262_v15, 0.0 }
  0x95   : > { %v230_v49 = vpop.permute.xlu1 %229  ;;  %v226_v50 = vpop.permute.xlu0 %225 }
  0x96   : > { %v251_v55 = vsub.f32 %v734_v0, %v230_v49  ;;  %v249_v56 = vsub.f32 %v736_v1, %v226_v50  ;;  %v335_v49 = vlaneseq }
  0x98   : > { %v259_v10 = vmul.f32 %v251_v55, %v251_v55  ;;  %v257_v11 = vmul.f32 %v249_v56, %v249_v56  ;;  %v336_v50 = vand.u32 127, %v335_v49 }
  0x9a   : > { %v304_v16 = vsel %vm302_vm5, %v259_v10, 0.0  ;;  %v303_v2 = vsel %vm302_vm5, %v257_v11, 0.0  ;;  %vm337_vm7 = vcmp.eq.s32.totalorder %v336_v50, 0 }
  0x9b   : > { %v305_v18 = vadd.f32 %v304_v16, %v303_v2 }
  0x9d   : > { %v232_v63 = vpop.permute.xlu1 %231  ;;  %v228_v8 = vpop.permute.xlu0 %227 }
  0x9e   : > { %v252_v12 = vsub.f32 %v743_v3, %v232_v63  ;;  %v250_v0 = vsub.f32 %v745_v4, %v228_v8  ;;  %v306_v4 = vsel %vm302_vm5, %v261_v14, 0.0 }
  0x9f   : > { %v307_v26 = vadd.f32 %v306_v4, %v305_v18 }
  0xa0   : > { %v260_v1 = vmul.f32 %v252_v12, %v252_v12  ;;  %v258_v13 = vmul.f32 %v250_v0, %v250_v0 }
  0xa2   : > { %v311_v17 = vsel %vm302_vm5, %v260_v1, 0.0  ;;  %v310_v5 = vsel %vm302_vm5, %v258_v13, 0.0 }
  0xa3   : > { %v312_v19 = vadd.f32 %v311_v17, %v310_v5 }
  0xa5   : > { %v240_v20 = vpop.permute.xlu1 %239  ;;  %v238_v3 = vpop.permute.xlu0 %237  ;;  %v314_v27 = vadd.f32 %v313_v21, %v312_v19 }
  0xa6   : > { %v256_v22 = vsub.f32 %v752_v6, %v240_v20  ;;  %v255_v23 = vsub.f32 %v754_v7, %v238_v3 }
  0xa8   : > { %v264_v24 = vmul.f32 %v256_v22, %v256_v22  ;;  %v263_v25 = vmul.f32 %v255_v23, %v255_v23 }
  0xaa   : > { %v315_v28 = vsel %vm302_vm5, %v264_v24, 0.0  ;;  %v308_v29 = vsel %vm302_vm5, %v263_v25, 0.0 }
  0xab   : > { %v316_v30 = vadd.f32 %v315_v28, %v314_v27  ;;  %v309_v31 = vadd.f32 %v308_v29, %v307_v26 }
  0xad   : > { %v317_v32 = vsel %vm302_vm5, %v309_v31, 0.0  ;;  %v318_v33 = vsel %vm302_vm5, %v316_v30, 0.0 }
  0xae   : > { %v319_v34 = vadd.f32 %v318_v33, %v317_v32 }
  0xb0   : > { %321 = vrot.lane.b32.xlu2 %v319_v34, %s641_s17 }
  0xd0   : > { %v294_v35 = vpop.xlane.xlu0 %293 }
  0xd1   : > { %v295_v36 = vrot.slane %v294_v35, 4 }
  0xd3   : > { %v296_v37 = vadd.f32 %v295_v36, %v294_v35 }
  0xd5   : > { %v297_v38 = vrot.slane %v296_v37, 2 }
  0xd7   : > { %v298_v39 = vadd.f32 %v297_v38, %v296_v37 }
  0xd9   : > { %v299_v40 = vrot.slane %v298_v39, 1 }
  0xdb   : > { %v300_v41 = vadd.f32 %v299_v40, %v298_v39 }
  0xdd   : > { %454 = vpush %v300_v41 }
 0x10a   : > { %v322_v6 = vpop.permute.xlu2 %321 }
 0x10b   : > { %v325_v7 = vsel %vm324_vm6, %v322_v6, 0.0 }
 0x10c   : > { %326 = vadd.xlane.f32.xlu1 %v325_v7 }
 0x10e   : > { %s455_s26 = spop %454 }
 0x10f   : > { %v338_v51 = vstv %s455_s26 }
 0x17f   : > { %v327_v42 = vpop.xlane.xlu1 %326 }
 0x180   : > { %v328_v43 = vrot.slane %v327_v42, 4 }
 0x182   : > { %v329_v44 = vadd.f32 %v328_v43, %v327_v42 }
 0x184   : > { %v330_v45 = vrot.slane %v329_v44, 2 }
 0x186   : > { %v331_v46 = vadd.f32 %v330_v45, %v329_v44 }
 0x188   : > { %v332_v47 = vrot.slane %v331_v46, 1 }
 0x18a   : > { %v333_v48 = vadd.f32 %v332_v47, %v331_v46 }
 0x18c   : > { %456 = vpush %v333_v48 }
 0x1bd   : > { %s457_s28 = spop %456 }
 0x1be   : > { %v339_v52 = vstv %s457_s28 }
 0x1bf   : > { %v340_v53 = vsel %vm337_vm7, %v338_v51, %v339_v52 }
 0x1c0   : > { %342 = vst.msk [vmem:[%s167_s24] sm:$0x1] %vm341_vm8, %v340_v53 }
 0x1c1   : > { %581 = shalt.err (!%p578_p13)
}
 0x1c2   : > { %460 = dma.vmem_to_hbm [thread:$0]  (%p703_p9), %s357_s25, 16, %s359_s27, %s344_s29  }
 0x1c3 PF: > { %s370_s5 = sand.u32 1, %s616_s6   ;;  %p467_p0 = pnand %p445_p12, %p710_p11 }
 0x1c4   : > { %s371_s15 = scalar_lea.sflag [#allocation4], %s370_s5 }
 0x1c5   : > { %p468_p1 = pneg %p467_p0 }
 0x1c7   : > { %611 = dma.done.wait (%p468_p1), %s371_s15, 16  }
 0x1c8   : > { %613 = vsyncadd (%p468_p1), %s371_s15, 4294967280  ;;  %s17_s11 = sadd.s32 1, %s636_s11   ;;  %s850_s6 = smov %s620_s7 }
 0x1c9   : > { %p14_p2 = scmp.ge.s32.totalorder %s17_s11, 4   ;;  %s851_s7 = smov %s624_s8 }
 0x1ca   : > { %s852_s8 = smov %s708_s20  ;;  %s853_s9 = smov %s632_s10 }
 0x1cb   : > { %s854_s10 = smov %s856_s14  ;;  %16 = sbr.rel (!%p14_p2) target bundleno = 6 (0x6), region = 69 }
 0x1d0   :  { %376 = vsyncpa [#allocation3], 1 }
 0x1d1   :  { %378 = vsyncpa [#allocation3 + $0x1], 1 }
 0x1d2   :  { %379 = vsyncpa [#allocation4], 1 }
 0x1d3   :  { %381 = vsyncpa [#allocation4 + $0x1], 1 }

</bundles_post_ra>
